<compile_context>
chip_gen: v7x
topology: tpu7x:2x2x1
jax: 0.10.0
libtpu: 0.0.40
codegen_flags: <defaults>
</compile_context>

<pallas_src>
import functools

import jax
import jax.numpy as jnp
import numpy as np
from jax.experimental import pallas as pl
from jax.experimental.pallas import tpu as pltpu

EPS = 1e-12  # matches torch.nn.functional.normalize default eps


def _l2norm(x):
    # x / max(||x||, eps) written with rsqrt so it lands on the EUP slot.
    n2 = jnp.sum(x * x, axis=-1, keepdims=True)
    return x * jax.lax.rsqrt(jnp.maximum(n2, EPS * EPS))


def _pick_class_tile(num_cls, max_tile=512):
    """Largest multiple-of-8 divisor of num_cls <= max_tile, else one tile.

    Tile sizing note: resident VMEM per step is roughly
      feat(B,D,f32) + feat(B,D,bf16) + src(S,D,f32)
      + 2x memory tile (tc,D,f32) + 2x new-memory tile (tc,D,f32).
    Keep that under ~24 MiB for the 32 MiB default scoped limit (v5e/v6e) and
    under ~48 MiB on v7x (64 MiB physical VMEM); shrink max_tile for huge D.
    """
    if num_cls <= max_tile:
        return num_cls
    for tc in range(max_tile - (max_tile % 8), 7, -8):
        if num_cls % tc == 0:
            return tc
    # TODO(synk): pad the class axis (mask padded logits to -inf and divide the
    # memo_change by the true num_cls) for class counts with no usable divisor.
    return num_cls


def memory_forward_kernel(inv_t, num_cls, use_src,
                          lab_row_ref, lab_col_ref, feat_ref, mem_ref, src_ref,
                          loss_ref, newmem_ref, change_ref,
                          feat_q, m_sc, l_sc, tgt_sc):
    i = pl.program_id(0)
    n_tiles = pl.num_programs(0)
    b = feat_ref.shape[0]
    tc = mem_ref.shape[0]

    @pl.when(i == 0)
    def _init():
        # Normalize once; fold 1/t into feat (the positive scale cancels inside
        # the batch-center normalization, so one bf16 copy serves every matmul).
        feat_q[...] = (_l2norm(feat_ref[...]) * inv_t).astype(jnp.bfloat16)
        m_sc[...] = jnp.full_like(m_sc, -jnp.inf)
        l_sc[...] = jnp.zeros_like(l_sc)
        tgt_sc[...] = jnp.zeros_like(tgt_sc)
        change_ref[0, 0] = jnp.float32(0.0)

    lab_col = lab_col_ref[...]                         # (B, 1) int32
    lab_row = lab_row_ref[...]                         # (1, B) int32
    fq = feat_q[...]                                   # (B, D) bf16 = normalize(feat)/t

    # ---- lane-dense (B, TC) one-hot: reused for segment-sum and CE target ----
    cls_ids = jax.lax.broadcasted_iota(jnp.int32, (b, tc), 1) + i * tc
    tgt_mask = cls_ids == lab_col                      # (B, TC) bool
    onehot = tgt_mask.astype(jnp.bfloat16)             # 0/1 exact in bf16

    # segment-sum of features per class on the MXU: onehot^T @ feat -> (TC, D)
    bsum = jax.lax.dot_general(onehot, fq, (((0,), (0,)), ((), ())),
                               preferred_element_type=jnp.float32)
    batch_center = _l2norm(bsum)                       # 1/t scale cancels here

    # class-present flags in (TC, 1) layout (tiny (TC, B) compare + lane reduce)
    cls_iota_cb = jax.lax.broadcasted_iota(jnp.int32, (tc, b), 0) + i * tc
    counts = jnp.sum((cls_iota_cb == lab_row).astype(jnp.float32),
                     axis=-1, keepdims=True)           # (TC, 1)
    flags = (counts > 0.0).astype(jnp.float32)

    # ---- update_center_by_simi (this class tile) ----
    old = mem_ref[...]                                 # (TC, D) f32
    uw = jnp.sum(old * batch_center, axis=-1, keepdims=True)
    uw = 1.0 - (1.0 - uw) * flags
    new_mem = _l2norm(uw * old + (1.0 - uw) * batch_center)
    newmem_ref[...] = new_mem
    change_ref[0, 0] += jnp.sum(
        jnp.sum(new_mem * old, axis=-1, keepdims=True)) * (1.0 / num_cls)

    # ---- logits for this class tile (already divided by t via feat_q) ----
    logits = jax.lax.dot_general(fq, new_mem.astype(jnp.bfloat16),
                                 (((1,), (1,)), ((), ())),
                                 preferred_element_type=jnp.float32)  # (B, TC)

    # target logit (each label falls in exactly one class tile)
    tgt_sc[...] += jnp.sum(jnp.where(tgt_mask, logits, 0.0),
                           axis=-1, keepdims=True)

    # online softmax over the class axis
    m_new = jnp.maximum(m_sc[...], jnp.max(logits, axis=-1, keepdims=True))
    l_sc[...] = (jnp.exp(m_sc[...] - m_new) * l_sc[...]
                 + jnp.sum(jnp.exp(logits - m_new), axis=-1, keepdims=True))
    m_sc[...] = m_new

    @pl.when(i == n_tiles - 1)
    def _finalize():
        m_run = m_sc[...]
        l_run = l_sc[...]
        if use_src:                                    # static Python bool
            logits_s = jax.lax.dot_general(
                feat_q[...], src_ref[...].astype(jnp.bfloat16),
                (((1,), (1,)), ((), ())),
                preferred_element_type=jnp.float32)    # (B, S), already /t
            m_fin = jnp.maximum(m_run, jnp.max(logits_s, axis=-1, keepdims=True))
            l_fin = (jnp.exp(m_run - m_fin) * l_run
                     + jnp.sum(jnp.exp(logits_s - m_fin), axis=-1, keepdims=True))
        else:
            m_fin, l_fin = m_run, l_run
        lse = jnp.log(l_fin) + m_fin                   # (B, 1)
        loss_ref[0, 0] = jnp.sum(lse - tgt_sc[...]) * (1.0 / b)


def memory_forward(feat, label, memory, source_memo, t=1.0, joint=True,
                   class_tile=None, vmem_limit_bytes=None):
    """Returns (loss, new_memory, memo_change) — new_memory is the updated buffer."""
    b, d = feat.shape
    num_cls = memory.shape[0]
    num_src = source_memo.shape[0]
    use_src = bool(joint) and num_src > 0

    lab_row = label.reshape(1, b).astype(jnp.int32)
    lab_col = label.reshape(b, 1).astype(jnp.int32)

    tc = int(class_tile) if class_tile is not None else _pick_class_tile(num_cls)
    assert num_cls % tc == 0 and (tc % 8 == 0 or tc == num_cls), (
        "class tile must divide num_cls and be a multiple of 8 (or the full axis)")
    n_tiles = num_cls // tc

    src_arg = source_memo if use_src else jnp.zeros((8, d), jnp.float32)
    s_rows = int(src_arg.shape[0])

    kernel = functools.partial(memory_forward_kernel,
                               float(1.0 / t), num_cls, use_src)

    smem = pltpu.MemorySpace.SMEM
    grid_spec = pltpu.PrefetchScalarGridSpec(
        num_scalar_prefetch=0,
        grid=(n_tiles,),
        in_specs=[
            pl.BlockSpec((1, b), lambda i: (0, 0)),        # label row view
            pl.BlockSpec((b, 1), lambda i: (0, 0)),        # label col view
            pl.BlockSpec((b, d), lambda i: (0, 0)),        # feat
            pl.BlockSpec((tc, d), lambda i: (i, 0)),       # memory class tile
            pl.BlockSpec((s_rows, d), lambda i: (0, 0)),   # source memo (whole)
        ],
        out_specs=(
            pl.BlockSpec((1, 1), lambda i: (0, 0), memory_space=smem),   # loss
            pl.BlockSpec((tc, d), lambda i: (i, 0)),                     # new memory
            pl.BlockSpec((1, 1), lambda i: (0, 0), memory_space=smem),   # memo_change
        ),
        scratch_shapes=[
            pltpu.VMEM((b, d), jnp.bfloat16),   # normalized feat / t (bf16 for MXU)
            pltpu.VMEM((b, 1), jnp.float32),    # softmax running max
            pltpu.VMEM((b, 1), jnp.float32),    # softmax running sum-exp
            pltpu.VMEM((b, 1), jnp.float32),    # target logit accumulator
        ],
    )

    cp_kwargs = dict(dimension_semantics=("arbitrary",))
    if vmem_limit_bytes is not None:
        cp_kwargs["vmem_limit_bytes"] = int(vmem_limit_bytes)

    loss, new_mem, change = pl.pallas_call(
        kernel,
        grid_spec=grid_spec,
        out_shape=(
            jax.ShapeDtypeStruct((1, 1), jnp.float32),         # loss
            jax.ShapeDtypeStruct((num_cls, d), jnp.float32),   # updated memory
            jax.ShapeDtypeStruct((1, 1), jnp.float32),         # memo_change
        ),
        compiler_params=pltpu.CompilerParams(**cp_kwargs),
    )(lab_row, lab_col, feat, memory, src_arg)
    return loss[0, 0], new_mem, change[0, 0]


def memory_forward_reference(feat, label, memory, source_memo, t=1.0, joint=True):
    """Pure-JAX (f32) mirror of Memory.forward for correctness checking."""
    b = feat.shape[0]
    num_cls = memory.shape[0]
    feat_n = _l2norm(feat)
    onehot = (jnp.arange(num_cls)[:, None] == label[None, :]).astype(jnp.float32)
    counts = onehot.sum(-1, keepdims=True)
    flags = (counts > 0).astype(jnp.float32)
    batch_center = _l2norm(onehot @ feat_n)
    uw = jnp.sum(memory * batch_center, -1, keepdims=True)
    uw = 1.0 - (1.0 - uw) * flags
    new_mem = _l2norm(uw * memory + (1.0 - uw) * batch_center)
    memo = (jnp.concatenate([new_mem, source_memo], 0)
            if (joint and source_memo.shape[0] > 0) else new_mem)
    logits = (feat_n @ memo.T) / t
    lse = jax.scipy.special.logsumexp(logits, axis=-1)
    tgt = logits[jnp.arange(b), label]
    loss = jnp.mean(lse - tgt)
    change = jnp.mean(jnp.sum(new_mem * memory, -1))
    return loss, new_mem, change


if __name__ == "__main__":
    B, D, NUM_CLS, NUM_SRC = 8, 128, 16, 6
    T = 0.5
    key = jax.random.PRNGKey(0)
    k1, k2, k3, k4 = jax.random.split(key, 4)

    feat = jax.random.normal(k1, (B, D), jnp.float32)
    label = jax.random.randint(k2, (B,), 0, NUM_CLS, dtype=jnp.int32)
    # Deterministic state init mirroring Memory.init / Memory.init_source
    # (L2-normalized centers; the raw __init__ buffers are just zeros).
    memory = _l2norm(jax.random.normal(k3, (NUM_CLS, D), jnp.float32))
    source_memo = _l2norm(jax.random.normal(k4, (NUM_SRC, D), jnp.float32))

    ref_loss, ref_mem, ref_change = memory_forward_reference(
        feat, label, memory, source_memo, t=T, joint=True)

    # Run once with a single class tile and once with a forced 2-tile class grid
    # (exercises the online softmax / accumulator path). bf16 MXU operands ->
    # slightly looser tolerance vs. the f32 reference.
    for ct in (None, 8):
        loss, new_mem, change = memory_forward(
            feat, label, memory, source_memo, t=T, joint=True, class_tile=ct)
        jax.block_until_ready((loss, new_mem, change))
        np.testing.assert_allclose(np.asarray(loss), np.asarray(ref_loss),
                                   atol=2e-2, rtol=2e-2)
        np.testing.assert_allclose(np.asarray(new_mem), np.asarray(ref_mem),
                                   atol=2e-2, rtol=2e-2)
        np.testing.assert_allclose(np.asarray(change), np.asarray(ref_change),
                                   atol=2e-2, rtol=2e-2)

    print("KERNEL_OK")
</pallas_src>

<mosaic_0001>
module attributes {stable_mosaic.version = 11 : i64} {
  func.func @memory_forward_kernel(%arg0: i32, %arg1: memref<1x8xi32, #tpu.memory_space<vmem>>, %arg2: memref<8x1xi32, #tpu.memory_space<vmem>>, %arg3: memref<8x128xf32, #tpu.memory_space<vmem>>, %arg4: memref<16x128xf32, #tpu.memory_space<vmem>>, %arg5: memref<6x128xf32, #tpu.memory_space<vmem>>, %arg6: memref<1x1xf32, #tpu.memory_space<smem>>, %arg7: memref<16x128xf32, #tpu.memory_space<vmem>>, %arg8: memref<1x1xf32, #tpu.memory_space<smem>>, %arg9: memref<8x128xbf16, #tpu.memory_space<vmem>>, %arg10: memref<8x1xf32, #tpu.memory_space<vmem>>, %arg11: memref<8x1xf32, #tpu.memory_space<vmem>>, %arg12: memref<8x1xf32, #tpu.memory_space<vmem>>) attributes {dimension_semantics = [#tpu.dimension_semantics<arbitrary>], iteration_bounds = array<i64: 1>, scalar_prefetch = 0 : i64, scratch_operands = 4 : i64, tpu.core_type = #tpu.core_type<tc>, window_params = [{pipeline_mode = #tpu.pipeline_mode<synchronous>, transform_indices = @transform_0, window_bounds = array<i64: 1, 8>}, {pipeline_mode = #tpu.pipeline_mode<synchronous>, transform_indices = @transform_1, window_bounds = array<i64: 8, 1>}, {pipeline_mode = #tpu.pipeline_mode<synchronous>, transform_indices = @transform_2, window_bounds = array<i64: 8, 128>}, {transform_indices = @transform_3, window_bounds = array<i64: 16, 128>}, {pipeline_mode = #tpu.pipeline_mode<synchronous>, transform_indices = @transform_4, window_bounds = array<i64: 6, 128>}, {transform_indices = @transform_5, window_bounds = array<i64: 1, 1>}, {transform_indices = @transform_6, window_bounds = array<i64: 16, 128>}, {transform_indices = @transform_7, window_bounds = array<i64: 1, 1>}]} {
    %c0_i32 = arith.constant 0 : i32
    %0 = arith.cmpi eq, %arg0, %c0_i32 : i32
    %1 = arith.extui %0 : i1 to i32
    %c0_i32_0 = arith.constant 0 : i32
    %2 = arith.cmpi ne, %1, %c0_i32_0 : i32
    scf.if %2 {
      %c0_49 = arith.constant 0 : index
      %c0_50 = arith.constant 0 : index
      %103 = vector.load %arg3[%c0_49, %c0_50] : memref<8x128xf32, #tpu.memory_space<vmem>>, vector<8x128xf32>
      %104 = arith.mulf %103, %103 : vector<8x128xf32>
      %cst_51 = arith.constant dense<0.000000e+00> : vector<8xf32>
      %105 = vector.multi_reduction <add>, %104, %cst_51 [1] : vector<8x128xf32> to vector<8xf32>
      %106 = vector.shape_cast %105 : vector<8xf32> to vector<8x1xf32>
      %cst_52 = arith.constant 1.000000e-24 : f32
      %107 = vector.broadcast %cst_52 : f32 to vector<8x1xf32>
      %108 = arith.maximumf %106, %107 : vector<8x1xf32>
      %109 = math.rsqrt %108 : vector<8x1xf32>
      %110 = vector.broadcast %109 : vector<8x1xf32> to vector<8x128xf32>
      %111 = arith.mulf %103, %110 : vector<8x128xf32>
      %cst_53 = arith.constant 2.000000e+00 : f32
      %112 = vector.broadcast %cst_53 : f32 to vector<8x128xf32>
      %113 = arith.mulf %111, %112 : vector<8x128xf32>
      %114 = arith.truncf %113 : vector<8x128xf32> to vector<8x128xbf16>
      %c0_54 = arith.constant 0 : index
      %c0_55 = arith.constant 0 : index
      %115 = vector.load %arg9[%c0_54, %c0_55] : memref<8x128xbf16, #tpu.memory_space<vmem>>, vector<8x128xbf16>
      tpu.vector_store %arg9[%c0_54, %c0_55], %114 {strides = array<i32>} : memref<8x128xbf16, #tpu.memory_space<vmem>>, vector<8x128xbf16>,
      %cst_56 = arith.constant 0xFF800000 : f32
      %116 = vector.broadcast %cst_56 : f32 to vector<8x1xf32>
      %c0_57 = arith.constant 0 : index
      %c0_58 = arith.constant 0 : index
      %117 = vector.load %arg10[%c0_57, %c0_58] : memref<8x1xf32, #tpu.memory_space<vmem>>, vector<8x1xf32>
      tpu.vector_store %arg10[%c0_57, %c0_58], %116 {strides = array<i32>} : memref<8x1xf32, #tpu.memory_space<vmem>>, vector<8x1xf32>,
      %cst_59 = arith.constant 0.000000e+00 : f32
      %118 = vector.broadcast %cst_59 : f32 to vector<8x1xf32>
      %c0_60 = arith.constant 0 : index
      %c0_61 = arith.constant 0 : index
      %119 = vector.load %arg11[%c0_60, %c0_61] : memref<8x1xf32, #tpu.memory_space<vmem>>, vector<8x1xf32>
      tpu.vector_store %arg11[%c0_60, %c0_61], %118 {strides = array<i32>} : memref<8x1xf32, #tpu.memory_space<vmem>>, vector<8x1xf32>,
      %cst_62 = arith.constant 0.000000e+00 : f32
      %120 = vector.broadcast %cst_62 : f32 to vector<8x1xf32>
      %c0_63 = arith.constant 0 : index
      %c0_64 = arith.constant 0 : index
      %121 = vector.load %arg12[%c0_63, %c0_64] : memref<8x1xf32, #tpu.memory_space<vmem>>, vector<8x1xf32>
      tpu.vector_store %arg12[%c0_63, %c0_64], %120 {strides = array<i32>} : memref<8x1xf32, #tpu.memory_space<vmem>>, vector<8x1xf32>,
      %cst_65 = arith.constant 0.000000e+00 : f32
      %c0_66 = arith.constant 0 : index
      %c0_67 = arith.constant 0 : index
      %122 = memref.load %arg8[%c0_66, %c0_67] : memref<1x1xf32, #tpu.memory_space<smem>>
      memref.store %cst_65, %arg8[%c0_66, %c0_67] : memref<1x1xf32, #tpu.memory_space<smem>>
    } else {
    }
    %c0 = arith.constant 0 : index
    %c0_1 = arith.constant 0 : index
    %3 = vector.load %arg2[%c0, %c0_1] : memref<8x1xi32, #tpu.memory_space<vmem>>, vector<8x1xi32>
    %c0_2 = arith.constant 0 : index
    %c0_3 = arith.constant 0 : index
    %4 = vector.load %arg1[%c0_2, %c0_3] : memref<1x8xi32, #tpu.memory_space<vmem>>, vector<1x8xi32>
    %c0_4 = arith.constant 0 : index
    %c0_5 = arith.constant 0 : index
    %5 = vector.load %arg9[%c0_4, %c0_5] : memref<8x128xbf16, #tpu.memory_space<vmem>>, vector<8x128xbf16>
    %6 = tpu.iota {dimensions = array<i32: 1>} : vector<8x16xi32>
    %c16_i32 = arith.constant 16 : i32
    %7 = arith.muli %arg0, %c16_i32 : i32
    %8 = vector.broadcast %7 : i32 to vector<8x16xi32>
    %9 = arith.addi %6, %8 : vector<8x16xi32>
    %10 = vector.broadcast %3 : vector<8x1xi32> to vector<8x16xi32>
    %11 = arith.cmpi eq, %9, %10 : vector<8x16xi32>
    %12 = arith.extui %11 : vector<8x16xi1> to vector<8x16xi32>
    %13 = arith.sitofp %12 : vector<8x16xi32> to vector<8x16xf32>
    %14 = arith.truncf %13 : vector<8x16xf32> to vector<8x16xbf16>
    %cst = arith.constant dense<0.000000e+00> : vector<16x128xf32>
    %15 = tpu.matmul %14, %5, %cst {dimension_numbers = #tpu.dot_dimension_numbers<[0], [0], [1], [1], [0, 1, 1, 1], [], []>} : vector<8x16xbf16>, vector<8x128xbf16>, vector<16x128xf32> -> vector<16x128xf32>
    %16 = arith.mulf %15, %15 : vector<16x128xf32>
    %cst_6 = arith.constant dense<0.000000e+00> : vector<16xf32>
    %17 = vector.multi_reduction <add>, %16, %cst_6 [1] : vector<16x128xf32> to vector<16xf32>
    %18 = vector.shape_cast %17 : vector<16xf32> to vector<16x1xf32>
    %cst_7 = arith.constant 1.000000e-24 : f32
    %19 = vector.broadcast %cst_7 : f32 to vector<16x1xf32>
    %20 = arith.maximumf %18, %19 : vector<16x1xf32>
    %21 = math.rsqrt %20 : vector<16x1xf32>
    %22 = vector.broadcast %21 : vector<16x1xf32> to vector<16x128xf32>
    %23 = arith.mulf %15, %22 : vector<16x128xf32>
    %24 = tpu.iota {dimensions = array<i32: 0>} : vector<16x8xi32>
    %c16_i32_8 = arith.constant 16 : i32
    %25 = arith.muli %arg0, %c16_i32_8 : i32
    %26 = vector.broadcast %25 : i32 to vector<16x8xi32>
    %27 = arith.addi %24, %26 : vector<16x8xi32>
    %28 = vector.broadcast %4 : vector<1x8xi32> to vector<16x8xi32>
    %29 = arith.cmpi eq, %27, %28 : vector<16x8xi32>
    %30 = arith.extui %29 : vector<16x8xi1> to vector<16x8xi32>
    %31 = arith.sitofp %30 : vector<16x8xi32> to vector<16x8xf32>
    %cst_9 = arith.constant dense<0.000000e+00> : vector<16xf32>
    %32 = vector.multi_reduction <add>, %31, %cst_9 [1] : vector<16x8xf32> to vector<16xf32>
    %33 = vector.shape_cast %32 : vector<16xf32> to vector<16x1xf32>
    %cst_10 = arith.constant 0.000000e+00 : f32
    %34 = vector.broadcast %cst_10 : f32 to vector<16x1xf32>
    %35 = arith.cmpf ogt, %33, %34 : vector<16x1xf32>
    %36 = arith.extui %35 : vector<16x1xi1> to vector<16x1xi32>
    %37 = arith.sitofp %36 : vector<16x1xi32> to vector<16x1xf32>
    %c0_11 = arith.constant 0 : index
    %c0_12 = arith.constant 0 : index
    %38 = vector.load %arg4[%c0_11, %c0_12] : memref<16x128xf32, #tpu.memory_space<vmem>>, vector<16x128xf32>
    %39 = arith.mulf %38, %23 : vector<16x128xf32>
    %cst_13 = arith.constant dense<0.000000e+00> : vector<16xf32>
    %40 = vector.multi_reduction <add>, %39, %cst_13 [1] : vector<16x128xf32> to vector<16xf32>
    %41 = vector.shape_cast %40 : vector<16xf32> to vector<16x1xf32>
    %cst_14 = arith.constant 1.000000e+00 : f32
    %42 = vector.broadcast %cst_14 : f32 to vector<16x1xf32>
    %43 = arith.subf %42, %41 : vector<16x1xf32>
    %44 = arith.mulf %43, %37 : vector<16x1xf32>
    %cst_15 = arith.constant 1.000000e+00 : f32
    %45 = vector.broadcast %cst_15 : f32 to vector<16x1xf32>
    %46 = arith.subf %45, %44 : vector<16x1xf32>
    %47 = vector.broadcast %46 : vector<16x1xf32> to vector<16x128xf32>
    %48 = arith.mulf %47, %38 : vector<16x128xf32>
    %cst_16 = arith.constant 1.000000e+00 : f32
    %49 = vector.broadcast %cst_16 : f32 to vector<16x1xf32>
    %50 = arith.subf %49, %46 : vector<16x1xf32>
    %51 = vector.broadcast %50 : vector<16x1xf32> to vector<16x128xf32>
    %52 = arith.mulf %51, %23 : vector<16x128xf32>
    %53 = arith.addf %48, %52 : vector<16x128xf32>
    %54 = arith.mulf %53, %53 : vector<16x128xf32>
    %cst_17 = arith.constant dense<0.000000e+00> : vector<16xf32>
    %55 = vector.multi_reduction <add>, %54, %cst_17 [1] : vector<16x128xf32> to vector<16xf32>
    %56 = vector.shape_cast %55 : vector<16xf32> to vector<16x1xf32>
    %cst_18 = arith.constant 1.000000e-24 : f32
    %57 = vector.broadcast %cst_18 : f32 to vector<16x1xf32>
    %58 = arith.maximumf %56, %57 : vector<16x1xf32>
    %59 = math.rsqrt %58 : vector<16x1xf32>
    %60 = vector.broadcast %59 : vector<16x1xf32> to vector<16x128xf32>
    %61 = arith.mulf %53, %60 : vector<16x128xf32>
    %c0_19 = arith.constant 0 : index
    %c0_20 = arith.constant 0 : index
    %62 = vector.load %arg7[%c0_19, %c0_20] : memref<16x128xf32, #tpu.memory_space<vmem>>, vector<16x128xf32>
    tpu.vector_store %arg7[%c0_19, %c0_20], %61 {strides = array<i32>} : memref<16x128xf32, #tpu.memory_space<vmem>>, vector<16x128xf32>,
    %c0_21 = arith.constant 0 : index
    %c0_22 = arith.constant 0 : index
    %63 = memref.load %arg8[%c0_21, %c0_22] : memref<1x1xf32, #tpu.memory_space<smem>>
    %64 = arith.mulf %61, %38 : vector<16x128xf32>
    %cst_23 = arith.constant dense<0.000000e+00> : vector<16xf32>
    %65 = vector.multi_reduction <add>, %64, %cst_23 [1] : vector<16x128xf32> to vector<16xf32>
    %66 = vector.shape_cast %65 : vector<16xf32> to vector<16x1xf32>
    %67 = vector.shape_cast %66 : vector<16x1xf32> to vector<1x16x1xf32>
    %cst_24 = arith.constant dense<0.000000e+00> : vector<1xf32>
    %68 = vector.multi_reduction <add>, %67, %cst_24 [1, 2] : vector<1x16x1xf32> to vector<1xf32>
    %69 = vector.shape_cast %68 : vector<1xf32> to vector<1x1x1xf32>
    %70 = vector.extract %69[0, 0, 0] : f32 from vector<1x1x1xf32>
    %cst_25 = arith.constant 6.250000e-02 : f32
    %71 = arith.mulf %70, %cst_25 : f32
    %72 = arith.addf %63, %71 : f32
    %c0_26 = arith.constant 0 : index
    %c0_27 = arith.constant 0 : index
    %73 = memref.load %arg8[%c0_26, %c0_27] : memref<1x1xf32, #tpu.memory_space<smem>>
    memref.store %72, %arg8[%c0_26, %c0_27] : memref<1x1xf32, #tpu.memory_space<smem>>
    %74 = arith.truncf %61 : vector<16x128xf32> to vector<16x128xbf16>
    %cst_28 = arith.constant dense<0.000000e+00> : vector<8x16xf32>
    %75 = tpu.matmul %5, %74, %cst_28 {dimension_numbers = #tpu.dot_dimension_numbers<[1], [1], [0], [0], [0, 0, 1, 0], [], []>} : vector<8x128xbf16>, vector<16x128xbf16>, vector<8x16xf32> -> vector<8x16xf32>
    %c0_29 = arith.constant 0 : index
    %c0_30 = arith.constant 0 : index
    %76 = vector.load %arg12[%c0_29, %c0_30] : memref<8x1xf32, #tpu.memory_space<vmem>>, vector<8x1xf32>
    %cst_31 = arith.constant 0.000000e+00 : f32
    %77 = vector.broadcast %cst_31 : f32 to vector<8x16xf32>
    %78 = arith.select %11, %75, %77 : vector<8x16xi1>, vector<8x16xf32>
    %cst_32 = arith.constant dense<0.000000e+00> : vector<8xf32>
    %79 = vector.multi_reduction <add>, %78, %cst_32 [1] : vector<8x16xf32> to vector<8xf32>
    %80 = vector.shape_cast %79 : vector<8xf32> to vector<8x1xf32>
    %81 = arith.addf %76, %80 : vector<8x1xf32>
    %c0_33 = arith.constant 0 : index
    %c0_34 = arith.constant 0 : index
    %82 = vector.load %arg12[%c0_33, %c0_34] : memref<8x1xf32, #tpu.memory_space<vmem>>, vector<8x1xf32>
    tpu.vector_store %arg12[%c0_33, %c0_34], %81 {strides = array<i32>} : memref<8x1xf32, #tpu.memory_space<vmem>>, vector<8x1xf32>,
    %c0_35 = arith.constant 0 : index
    %c0_36 = arith.constant 0 : index
    %83 = vector.load %arg10[%c0_35, %c0_36] : memref<8x1xf32, #tpu.memory_space<vmem>>, vector<8x1xf32>
    %cst_37 = arith.constant dense<0xFF800000> : vector<8xf32>
    %84 = vector.multi_reduction <maximumf>, %75, %cst_37 [1] : vector<8x16xf32> to vector<8xf32>
    %85 = vector.shape_cast %84 : vector<8xf32> to vector<8x1xf32>
    %86 = arith.maximumf %83, %85 : vector<8x1xf32>
    %c0_38 = arith.constant 0 : index
    %c0_39 = arith.constant 0 : index
    %87 = vector.load %arg10[%c0_38, %c0_39] : memref<8x1xf32, #tpu.memory_space<vmem>>, vector<8x1xf32>
    %88 = arith.subf %87, %86 : vector<8x1xf32>
    %89 = math.exp %88 : vector<8x1xf32>
    %c0_40 = arith.constant 0 : index
    %c0_41 = arith.constant 0 : index
    %90 = vector.load %arg11[%c0_40, %c0_41] : memref<8x1xf32, #tpu.memory_space<vmem>>, vector<8x1xf32>
    %91 = arith.mulf %89, %90 : vector<8x1xf32>
    %92 = vector.broadcast %86 : vector<8x1xf32> to vector<8x16xf32>
    %93 = arith.subf %75, %92 : vector<8x16xf32>
    %94 = math.exp %93 : vector<8x16xf32>
    %cst_42 = arith.constant dense<0.000000e+00> : vector<8xf32>
    %95 = vector.multi_reduction <add>, %94, %cst_42 [1] : vector<8x16xf32> to vector<8xf32>
    %96 = vector.shape_cast %95 : vector<8xf32> to vector<8x1xf32>
    %97 = arith.addf %91, %96 : vector<8x1xf32>
    %c0_43 = arith.constant 0 : index
    %c0_44 = arith.constant 0 : index
    %98 = vector.load %arg11[%c0_43, %c0_44] : memref<8x1xf32, #tpu.memory_space<vmem>>, vector<8x1xf32>
    tpu.vector_store %arg11[%c0_43, %c0_44], %97 {strides = array<i32>} : memref<8x1xf32, #tpu.memory_space<vmem>>, vector<8x1xf32>,
    %c0_45 = arith.constant 0 : index
    %c0_46 = arith.constant 0 : index
    %99 = vector.load %arg10[%c0_45, %c0_46] : memref<8x1xf32, #tpu.memory_space<vmem>>, vector<8x1xf32>
    tpu.vector_store %arg10[%c0_45, %c0_46], %86 {strides = array<i32>} : memref<8x1xf32, #tpu.memory_space<vmem>>, vector<8x1xf32>,
    %c0_i32_47 = arith.constant 0 : i32
    %100 = arith.cmpi eq, %arg0, %c0_i32_47 : i32
    %101 = arith.extui %100 : i1 to i32
    %c0_i32_48 = arith.constant 0 : i32
    %102 = arith.cmpi ne, %101, %c0_i32_48 : i32
    scf.if %102 {
      %c0_49 = arith.constant 0 : index
      %c0_50 = arith.constant 0 : index
      %103 = vector.load %arg10[%c0_49, %c0_50] : memref<8x1xf32, #tpu.memory_space<vmem>>, vector<8x1xf32>
      %c0_51 = arith.constant 0 : index
      %c0_52 = arith.constant 0 : index
      %104 = vector.load %arg11[%c0_51, %c0_52] : memref<8x1xf32, #tpu.memory_space<vmem>>, vector<8x1xf32>
      %c0_53 = arith.constant 0 : index
      %c0_54 = arith.constant 0 : index
      %105 = vector.load %arg9[%c0_53, %c0_54] : memref<8x128xbf16, #tpu.memory_space<vmem>>, vector<8x128xbf16>
      %c0_55 = arith.constant 0 : index
      %c0_56 = arith.constant 0 : index
      %106 = vector.load %arg5[%c0_55, %c0_56] : memref<6x128xf32, #tpu.memory_space<vmem>>, vector<6x128xf32>
      %107 = arith.truncf %106 : vector<6x128xf32> to vector<6x128xbf16>
      %cst_57 = arith.constant dense<0.000000e+00> : vector<8x6xf32>
      %108 = tpu.matmul %105, %107, %cst_57 {dimension_numbers = #tpu.dot_dimension_numbers<[1], [1], [0], [0], [0, 0, 1, 0], [], []>} : vector<8x128xbf16>, vector<6x128xbf16>, vector<8x6xf32> -> vector<8x6xf32>
      %cst_58 = arith.constant dense<0xFF800000> : vector<8xf32>
      %109 = vector.multi_reduction <maximumf>, %108, %cst_58 [1] : vector<8x6xf32> to vector<8xf32>
      %110 = vector.shape_cast %109 : vector<8xf32> to vector<8x1xf32>
      %111 = arith.maximumf %103, %110 : vector<8x1xf32>
      %112 = arith.subf %103, %111 : vector<8x1xf32>
      %113 = math.exp %112 : vector<8x1xf32>
      %114 = arith.mulf %113, %104 : vector<8x1xf32>
      %115 = vector.broadcast %111 : vector<8x1xf32> to vector<8x6xf32>
      %116 = arith.subf %108, %115 : vector<8x6xf32>
      %117 = math.exp %116 : vector<8x6xf32>
      %cst_59 = arith.constant dense<0.000000e+00> : vector<8xf32>
      %118 = vector.multi_reduction <add>, %117, %cst_59 [1] : vector<8x6xf32> to vector<8xf32>
      %119 = vector.shape_cast %118 : vector<8xf32> to vector<8x1xf32>
      %120 = arith.addf %114, %119 : vector<8x1xf32>
      %121 = math.log %120 : vector<8x1xf32>
      %122 = arith.addf %121, %111 : vector<8x1xf32>
      %c0_60 = arith.constant 0 : index
      %c0_61 = arith.constant 0 : index
      %123 = vector.load %arg12[%c0_60, %c0_61] : memref<8x1xf32, #tpu.memory_space<vmem>>, vector<8x1xf32>
      %124 = arith.subf %122, %123 : vector<8x1xf32>
      %125 = vector.shape_cast %124 : vector<8x1xf32> to vector<1x8x1xf32>
      %cst_62 = arith.constant dense<0.000000e+00> : vector<1xf32>
      %126 = vector.multi_reduction <add>, %125, %cst_62 [1, 2] : vector<1x8x1xf32> to vector<1xf32>
      %127 = vector.shape_cast %126 : vector<1xf32> to vector<1x1x1xf32>
      %128 = vector.extract %127[0, 0, 0] : f32 from vector<1x1x1xf32>
      %cst_63 = arith.constant 1.250000e-01 : f32
      %129 = arith.mulf %128, %cst_63 : f32
      %c0_64 = arith.constant 0 : index
      %c0_65 = arith.constant 0 : index
      %130 = memref.load %arg6[%c0_64, %c0_65] : memref<1x1xf32, #tpu.memory_space<smem>>
      memref.store %129, %arg6[%c0_64, %c0_65] : memref<1x1xf32, #tpu.memory_space<smem>>
    } else {
    }
    return
  }
  func.func @transform_0(%arg0: i32) -> (i32, i32) {
    %c0_i32 = arith.constant 0 : i32
    %c0_i32_0 = arith.constant 0 : i32
    %c0_i32_1 = arith.constant 0 : i32
    return %c0_i32, %c0_i32_0 : i32, i32
  }
  func.func @transform_1(%arg0: i32) -> (i32, i32) {
    %c0_i32 = arith.constant 0 : i32
    %c0_i32_0 = arith.constant 0 : i32
    %c0_i32_1 = arith.constant 0 : i32
    return %c0_i32, %c0_i32_0 : i32, i32
  }
  func.func @transform_2(%arg0: i32) -> (i32, i32) {
    %c0_i32 = arith.constant 0 : i32
    %c0_i32_0 = arith.constant 0 : i32
    %c0_i32_1 = arith.constant 0 : i32
    return %c0_i32, %c0_i32_0 : i32, i32
  }
  func.func @transform_3(%arg0: i32) -> (i32, i32) {
    %c0_i32 = arith.constant 0 : i32
    %c0_i32_0 = arith.constant 0 : i32
    return %arg0, %c0_i32 : i32, i32
  }
  func.func @transform_4(%arg0: i32) -> (i32, i32) {
    %c0_i32 = arith.constant 0 : i32
    %c0_i32_0 = arith.constant 0 : i32
    %c0_i32_1 = arith.constant 0 : i32
    return %c0_i32, %c0_i32_0 : i32, i32
  }
  func.func @transform_5(%arg0: i32) -> (i32, i32) {
    %c0_i32 = arith.constant 0 : i32
    %c0_i32_0 = arith.constant 0 : i32
    %c0_i32_1 = arith.constant 0 : i32
    return %c0_i32, %c0_i32_0 : i32, i32
  }
  func.func @transform_6(%arg0: i32) -> (i32, i32) {
    %c0_i32 = arith.constant 0 : i32
    %c0_i32_0 = arith.constant 0 : i32
    return %arg0, %c0_i32 : i32, i32
  }
  func.func @transform_7(%arg0: i32) -> (i32, i32) {
    %c0_i32 = arith.constant 0 : i32
    %c0_i32_0 = arith.constant 0 : i32
    %c0_i32_1 = arith.constant 0 : i32
    return %c0_i32, %c0_i32_0 : i32, i32
  }
}

</mosaic_0001>

<bundles_post_ra>
// kernel: tpu_custom_call.1
= control target key start
LH: loop header
LB: loop body
LE: loop exit
PB: predicated region body
PF: predicated region fallthrough
CT: control target
= control target key end

     0   :  { %13 = vsyncpa [#allocation7], 0  ;;  %s804_s0 = inlined_call_operand.hbm [shape: s32[1,8], index: 0, kind: input, shape index: {}]   ;;  %s805_s1 = inlined_call_operand.vmem [shape: s32[8,1], index: 1, kind: input, shape index: {}]   ;;  %s806_s2 = inlined_call_operand.hbm [shape: f32[8,128], index: 2, kind: input, shape index: {}]   ;;  %s807_s3 = inlined_call_operand.vmem [shape: f32[16,128], index: 3, kind: input, shape index: {}]   ;;  %s808_s4 = inlined_call_operand.vmem [shape: f32[6,128], index: 4, kind: input, shape index: {}]   ;;  %s809_s5 = inlined_call_operand.hbm [shape: f32[1,1], index: 5, kind: output, shape index: {0}]   ;;  %s810_s6 = inlined_call_operand.hbm [shape: f32[16,128], index: 6, kind: output, shape index: {1}]   ;;  %s811_s7 = inlined_call_operand.hbm [shape: f32[1,1], index: 7, kind: output, shape index: {2}]  }
   0x1   :  { %14 = vsyncpa [#allocation11], 0 }
   0x2   :  { %15 = vsyncpa [#allocation9], 0 }
   0x3   :  { %16 = vsyncpa [#allocation8], 0 }
   0x4   :  { %17 = vsyncpa [#allocation15], 0  ;;  %s618_s24 = smov [#allocation6]   ;;  %s619_s26 = smov [#allocation10]  }
   0x5   :  { %s24_s25 = sshll.u32 %s618_s24, 4  ;;  %s36_s27 = sshll.u32 %s619_s26, 4  ;;  %s25_s25 = int_to_ptr.vmem [resolvable:$true] %s24_s25  ;;  %s37_s27 = int_to_ptr.vmem [resolvable:$true] %s36_s27 }
   0x6   :  { %s522_s30 = scalar_lea.hbm %s804_s0, 16 }
   0x7   :  { %p523_p0 = scmp.ne.s32.totalorder %s804_s0, %s522_s30  ;;  %p526_p1 = scmp.lt.u32.totalorder %s522_s30, %s804_s0 }
   0x9   :  { %p528_p2 = pnand %p526_p1, %p523_p0 }
   0xb   :  { %531 = shalt.err (!%p528_p2)
}
   0xc   :  { %s532_s12 = scalar_lea.vmem %s25_s25, 16  ;;  %s536_s13 = scalar_lea.vmem %s25_s25, 32 }
   0xd   :  { %p533_p3 = scmp.ne.s32.totalorder %s25_s25, %s532_s12  ;;  %p537_p4 = scmp.lt.s32.totalorder %s25_s25, %s25_s25 }
   0xe   :  { %p538_p5 = scmp.lt.s32.totalorder %s536_s13, %s532_s12 }
  0x10   :  { %p539_p6 = por %p538_p5, %p537_p4 }
  0x12   :  { %p540_p7 = pnand %p539_p6, %p533_p3 }
  0x14   :  { %543 = shalt.err (!%p540_p7)
}
  0x15   :  { %27 = dma.hbm_to_vmem [thread:$0]  %s804_s0, 16, %s25_s25, [#allocation7]  }
  0x16   :  { %s544_s18 = scalar_lea.hbm %s806_s2, 128 }
  0x17   :  { %p545_p8 = scmp.ne.s32.totalorder %s806_s2, %s544_s18  ;;  %p548_p9 = scmp.lt.u32.totalorder %s544_s18, %s806_s2 }
  0x19   :  { %p550_p10 = pnand %p548_p9, %p545_p8 }
  0x1b   :  { %553 = shalt.err (!%p550_p10)
}
  0x1c   :  { %s554_s23 = scalar_lea.vmem %s37_s27, 128  ;;  %p559_p12 = scmp.lt.s32.totalorder %s37_s27, %s37_s27 }
  0x1d   :  { %p555_p11 = scmp.ne.s32.totalorder %s37_s27, %s554_s23  ;;  %p560_p13 = scmp.lt.s32.totalorder %s554_s23, %s554_s23 }
  0x1f   :  { %p561_p0 = por %p560_p13, %p559_p12 }
  0x21   :  { %p562_p1 = pnand %p561_p0, %p555_p11 }
  0x23   :  { %565 = shalt.err (!%p562_p1)
}
  0x24   :  { %39 = dma.hbm_to_vmem [thread:$0]  %s806_s2, 128, %s37_s27, [#allocation11]  }
  0x25   :  { %608 = dma.done.wait [#allocation7], 16  }
  0x26   :  { %609 = vsyncadd [#allocation7], 4294967280 }
  0x27   :  { %610 = dma.done.wait [#allocation11], 128  }
  0x28   :  { %611 = vsyncadd [#allocation11], 4294967168  ;;  %v620_v0 = vmov 0   ;;  %v71_v1 = vld [vmem:[%s805_s1] sm:$0xff]  ;;  %v621_v2 = vmov 0.0   ;;  %vm622_vm0 = vmmov 0   ;;  %v74_v5 = vlaneseq }
  0x29   :  { %500 = vset.pattern.permute.xlu0 %v620_v0  ;;  %466 = vmatprep.subr.bf16.mxu0 %v621_v2  ;;  %v55_v3 = vld [vmem:[#allocation10] sm:$0xff]  ;;  %vm106_vm2 = vcmask 1043456   ;;  %vm102_vm3 = vcmask 64512   ;;  %v455_v33 = vld [vmem:[#allocation6] ss:$0 sm:$0xff]  ;;  %v737_v48 = vld [vmem:[%s807_s3 + $0x8] sm:$0xff] }
  0x2a   :  { %80 = vperm.xlu0 %500, %v71_v1   ;;  %472 = vmatprep.subr.bf16.mxu1 %v621_v2  ;;  %v56_v4 = vmul.f32 %v55_v3, %v55_v3  ;;  %v702_v6 = vand.u32 127, %v74_v5  ;;  %v329_v18 = vld [vmem:[%s808_s4] sm:$0x3f]  ;;  %v164_v32 = vshrl.u32 %v74_v5, 7  ;;  %vm371_vm8 = vcmask 48128  }
  0x2b   :  { %468 = vmatprep.mubr.msk.bf16.mxu0 %vm622_vm0, %v621_v2  ;;  %474 = vmatprep.mubr.msk.bf16.mxu1 %vm622_vm0, %v621_v2  ;;  %v330_v19 = vpack.c.bf16 %v329_v18, %v329_v18  ;;  %v731_v44 = vld [vmem:[%s807_s3] sm:$0xff]  ;;  %vm65_vm9 = vcmask 7168   ;;  %vm293_vm10 = vcmask 130048   ;;  %s624_s3 = smov [#allocation13]  }
  0x2c   :  { %vm172_vm4 = vcmp.eq.s32.totalorder %v164_v32, %v455_v33  ;;  %v165_v34 = vadd.s32 8, %v164_v32  ;;  %67 = vst.msk [vmem:[#allocation4] sm:$0xff] %vm65_vm9, %v621_v2  ;;  %68 = vst.msk [vmem:[#allocation5] sm:$0xff] %vm65_vm9, %v621_v2  ;;  %s423_s30 = sshll.u32 %s624_s3, 4  ;;  %s424_s30 = int_to_ptr.vmem [resolvable:$true] %s423_s30 }
  0x2d   :  { %v456_v35 = vsel %vm172_vm4, 1.0, %v621_v2  ;;  %s566_s8 = scalar_lea.vmem %s424_s30, 256  ;;  %p571_p3 = scmp.lt.s32.totalorder %s424_s30, %s424_s30 }
  0x2e   :  { %v178_v36 = vsel %vm102_vm3, %v456_v35, 0.0  ;;  %vm173_vm5 = vcmp.eq.s32.totalorder %v165_v34, %v455_v33  ;;  %p567_p2 = scmp.ne.s32.totalorder %s424_s30, %s566_s8  ;;  %p572_p4 = scmp.lt.s32.totalorder %s566_s8, %s566_s8 }
  0x2f   :  { %v457_v37 = vsel %vm173_vm5, 1.0, %v621_v2 }
  0x30   :  { %v181_v38 = vsel %vm102_vm3, %v457_v37, 0.0  ;;  %p573_p5 = por %p572_p4, %p571_p3 }
  0x32   :  { %p574_p6 = pnand %p573_p5, %p567_p2 }
  0x49   :  { %57 = vadd.xlane.f32.xlu0 %v56_v4 }
  0xa9   :  { %v704_v7 = vpop.permute.xlu0 %80 }
  0xaa   :  { %vm82_vm1 = vcmp.eq.s32.totalorder %v702_v6, %v704_v7 }
  0xab   :  { %v453_v8 = vsel %vm82_vm1, 1.0, %v621_v2 }
  0xac   :  { %v85_v9 = vpack.c.bf16 %v453_v8, %v453_v8 }
  0xae   :  { %86 = vxpose.xlu1.c.b16.start.end [1/1] (short) (narrow) %v85_v9, 16 }
  0xb2   :  { %501 = vset.pattern.permute.xlu1 %v620_v0 }
  0xd6   :  { %v58_v10 = vpop.xlane.xlu0 %57 }
  0xd7   :  { %v59_v11 = vmax.f32 %v58_v10, 1e-24 }
  0xd9   :  { %502 = vrsqrt.f32 %v59_v11 }
  0xe3   :  { %v503_v12 = vpop.eup %502 }
  0xe4   :  { %v61_v13 = vmul.f32 %v503_v12, %v55_v3 }
  0xe6   :  { %v62_v14 = vmul.f32 2.0, %v61_v13 }
  0xe8   :  { %v63_v15 = vpack.c.bf16 %v62_v14, %v62_v14 }
  0xea   :  { %64 = vst [vmem:[#allocation2] sm:$0xf] %v63_v15 }
  0xf1   :  { %v712_v16 = vld [vmem:[#allocation2] sm:$0xf] }
  0xf2   :  { %v108_v17 = vsel %vm106_vm2, %v712_v16, 0  ;;  %v328_v21 = vld [vmem:[#allocation2] sm:$0xf] }
  0xf3   :  { %467 = vmatpush3.bf16.msra.mxu0 %v108_v17 }
  0xf4   :  { %478 = vmatprep.subr.bf16.mxu0 %v621_v2 }
 0x114   :  { %v94_v20 = vpop.trf.xlu1 }
 0x115   :  { %469 = vmatmul.mubr.msk.bf16.vlgmr.msra.gmra.mrb[0].mxu0 %vm102_vm3, %v94_v20 }
 0x116   :  { %479 = vmatpush3.bf16.xpose.msra.mxu0 %v330_v19  ;;  %480 = vmatprep.mubr.msk.bf16.mxu0 %vm622_vm0, %v621_v2 }
 0x11d   :  { %481 = vmatmul.mubr.bf16.vlgmr.msra.gmra.mrb[4].mxu0 %v328_v21 }
 0x1e8   :  { %v144_v22 = vpop.f32.mrb[0].mxu0 }
 0x1e9   :  { %v470_v23 = vpop.f32.mrb[1].mxu0  ;;  %v151_v24 = vmul.f32 %v144_v22, %v144_v22 }
 0x1ea   :  { %v147_v25 = vpop.f32.mrb[2].mxu0  ;;  %v623_v23 = vmov -inf  }
 0x1eb   :  { %153 = vadd.xlane.f32.xlu1 %v151_v24  ;;  %v471_v26 = vpop.f32.mrb[3].mxu0  ;;  %v152_v27 = vmul.f32 %v147_v25, %v147_v25  ;;  %66 = vst.msk [vmem:[#allocation3] sm:$0xff] %vm65_vm9, %v623_v23 }
 0x1ef   :  { %155 = vadd.xlane.f32.xlu1 %v152_v27 }
 0x1f0   :  { %v722_v28 = vpop.f32.mrb[4].mxu0 }
 0x1f1   :  { %v482_v29 = vpop.f32.mrb[5].mxu0  ;;  %v372_v12 = vsel %vm371_vm8, %v722_v28, -inf }
 0x1f2   :  { %v368_v30 = vpop.f32.mrb[6].mxu0 }
 0x1f3   :  { %v483_v31 = vpop.f32.mrb[7].mxu0  ;;  %179 = vadd.xlane.f32.xlu1 %v178_v36  ;;  %v299_v30 = vld [vmem:[#allocation3] sm:$0xff] }
 0x1f7   :  { %182 = vadd.xlane.f32.xlu1 %v181_v38 }
 0x278   :  { %v154_v39 = vpop.xlane.xlu1 %153 }
 0x279   :  { %v157_v40 = vmax.f32 %v154_v39, 1e-24 }
 0x27b   :  { %504 = vrsqrt.f32 %v157_v40 }
 0x27c   :  { %v156_v41 = vpop.xlane.xlu1 %155 }
 0x27d   :  { %v158_v42 = vmax.f32 %v156_v41, 1e-24 }
 0x27f   :  { %506 = vrsqrt.f32 %v158_v42 }
 0x280   :  { %v180_v51 = vpop.xlane.xlu1 %179 }
 0x281   :  { %vm184_vm6 = vcmp.gt.f32.partialorder %v180_v51, 0.0 }
 0x282   :  { %v458_v55 = vsel %vm184_vm6, 1.0, %v621_v2 }
 0x284   :  { %v183_v52 = vpop.xlane.xlu1 %182 }
 0x285   :  { %v505_v43 = vpop.eup %504  ;;  %vm185_vm7 = vcmp.gt.f32.partialorder %v183_v52, 0.0 }
 0x286   :  { %v161_v45 = vmul.f32 %v505_v43, %v144_v22  ;;  %v459_v60 = vsel %vm185_vm7, 1.0, %v621_v2 }
 0x288   :  { %v192_v46 = vmul.f32 %v731_v44, %v161_v45 }
 0x289   :  { %v507_v47 = vpop.eup %506 }
 0x28a   :  { %194 = vadd.xlane.f32.xlu1 %v192_v46  ;;  %v162_v49 = vmul.f32 %v507_v47, %v147_v25 }
 0x28c   :  { %v193_v50 = vmul.f32 %v737_v48, %v162_v49 }
 0x28e   :  { %196 = vadd.xlane.f32.xlu1 %v193_v50 }
 0x317   :  { %v195_v53 = vpop.xlane.xlu1 %194 }
 0x318   :  { %v198_v54 = vsub.f32 1.0, %v195_v53  ;;  %v307_v53 = vld [vmem:[#allocation4] sm:$0xff] }
 0x31a   :  { %v200_v56 = vmul.f32 %v458_v55, %v198_v54 }
 0x31b   :  { %v197_v57 = vpop.xlane.xlu1 %196 }
 0x31c   :  { %v202_v58 = vsub.f32 1.0, %v200_v56  ;;  %v199_v59 = vsub.f32 1.0, %v197_v57 }
 0x31e   :  { %v206_v61 = vsub.f32 1.0, %v202_v58  ;;  %v201_v62 = vmul.f32 %v459_v60, %v199_v59  ;;  %v204_v63 = vmul.f32 %v202_v58, %v731_v44  ;;  %v291_v59 = vld [vmem:[#allocation5] sm:$0xff] }
 0x320   :  { %v203_v0 = vsub.f32 1.0, %v201_v62  ;;  %v208_v1 = vmul.f32 %v206_v61, %v161_v45 }
 0x322   :  { %v207_v3 = vsub.f32 1.0, %v203_v0  ;;  %v210_v4 = vadd.f32 %v208_v1, %v204_v63  ;;  %v205_v5 = vmul.f32 %v203_v0, %v737_v48 }
 0x324   :  { %v212_v8 = vmul.f32 %v210_v4, %v210_v4  ;;  %v209_v9 = vmul.f32 %v207_v3, %v162_v49 }
 0x326   :  { %214 = vadd.xlane.f32.xlu0 %v212_v8  ;;  %v211_v10 = vadd.f32 %v209_v9, %v205_v5 }
 0x328   :  { %v213_v11 = vmul.f32 %v211_v10, %v211_v10 }
 0x32a   :  { %216 = vadd.xlane.f32.xlu1 %v213_v11 }
 0x32e   :  { %373 = vmax.xlane.f32.xlu1 %v372_v12 }
 0x3b3   :  { %v215_v13 = vpop.xlane.xlu0 %214 }
 0x3b4   :  { %v218_v14 = vmax.f32 %v215_v13, 1e-24 }
 0x3b6   :  { %508 = vrsqrt.f32 %v218_v14 }
 0x3b7   :  { %v217_v15 = vpop.xlane.xlu1 %216 }
 0x3b8   :  { %v219_v17 = vmax.f32 %v217_v15, 1e-24 }
 0x3ba   :  { %510 = vrsqrt.f32 %v219_v17 }
 0x3bb   :  { %v374_v33 = vpop.xlane.xlu1 %373 }
 0x3c0   :  { %v509_v18 = vpop.eup %508 }
 0x3c1   :  { %v222_v19 = vmul.f32 %v509_v18, %v210_v4 }
 0x3c3   :  { %224 = vst [vmem:[#allocation13] sm:$0xff] %v222_v19  ;;  %v227_v43 = vmul.f32 %v222_v19, %v731_v44 }
 0x3c4   :  { %v511_v20 = vpop.eup %510 }
 0x3c5   :  { %v223_v21 = vmul.f32 %v511_v20, %v211_v10 }
 0x3c7   :  { %v250_v22 = vpack.c.bf16 %v223_v21, %v222_v19  ;;  %225 = vst [vmem:[#allocation13 + $0x8] sm:$0xff] %v223_v21 }
 0x3c9   :  { %473 = vmatpush3.bf16.xpose.msra.mxu1 %v250_v22 }
 0x3d0   :  { %475 = vmatmul.mubr.bf16.vlgmr.msra.gmra.mrb[0].mxu1 %v712_v16 }
 0x4a3   :  { %v285_v24 = vpop.f32.mrb[0].mxu1 }
 0x4a4   :  { %v476_v25 = vpop.f32.mrb[1].mxu1  ;;  %v300_v26 = vsel %vm293_vm10, %v285_v24, -inf  ;;  %v292_v47 = vsel %vm82_vm1, %v285_v24, 0.0 }
 0x4a5   :  { %301 = vmax.xlane.f32.xlu0 %v300_v26  ;;  %v288_v27 = vpop.f32.mrb[2].mxu1  ;;  %v294_v49 = vsel %vm293_vm10, %v292_v47, 0.0 }
 0x4a6   :  { %v477_v29 = vpop.f32.mrb[3].mxu1 }
 0x532   :  { %v302_v16 = vpop.xlane.xlu0 %301 }
 0x533   :  { %v303_v31 = vmax.f32 %v299_v30, %v302_v16 }
 0x535   :  { %v304_v32 = vsub.f32 %v299_v30, %v303_v31  ;;  %322 = vst.msk [vmem:[#allocation3] sm:$0xff] %vm65_vm9, %v303_v31  ;;  %311 = vperm.xlu0 %500, %v303_v31  }
 0x537   :  { %v305_v50 = vmul.f32 1.442695, %v304_v32 }
 0x53c   :  { %v326_v34 = vld [vmem:[#allocation3] sm:$0xff] }
 0x53d   :  { %v375_v35 = vmax.f32 %v326_v34, %v374_v33 }
 0x53f   :  { %382 = vperm.xlu1 %501, %v375_v35   ;;  %v376_v51 = vsub.f32 %v326_v34, %v375_v35 }
 0x541   :  { %v377_v44 = vmul.f32 1.442695, %v376_v51 }
 0x5b4   :  { %v312_v2 = vpop.permute.xlu0 %311 }
 0x5b5   :  { %v314_v36 = vsub.f32 %v285_v24, %v312_v2 }
 0x5b7   :  { %v315_v37 = vmul.f32 1.442695, %v314_v36 }
 0x5b9   :  { %512 = vpow2.f32 %v315_v37 }
 0x5be   :  { %v383_v38 = vpop.permute.xlu1 %382 }
 0x5bf   :  { %v385_v39 = vsub.f32 %v722_v28, %v383_v38  ;;  %v228_v28 = vmul.f32 %v223_v21, %v737_v48 }
 0x5c1   :  { %v386_v40 = vmul.f32 1.442695, %v385_v39 }
 0x5c3   :  { %v513_v41 = vpop.eup %512  ;;  %514 = vpow2.f32 %v386_v40 }
 0x5c4   :  { %v317_v42 = vsel %vm293_vm10, %v513_v41, 0.0  ;;  %516 = vpow2.f32 %v305_v50 }
 0x5c5   :  { %318 = vadd.xlane.f32.xlu1 %v317_v42  ;;  %518 = vpow2.f32 %v377_v44 }
 0x5c9   :  { %229 = vadd.xlane.f32.xlu1 %v227_v43 }
 0x5cd   :  { %v515_v45 = vpop.eup %514 }
 0x5ce   :  { %v388_v46 = vsel %vm371_vm8, %v515_v45, 0.0  ;;  %v517_v52 = vpop.eup %516 }
 0x5cf   :  { %389 = vadd.xlane.f32.xlu0 %v388_v46  ;;  %v308_v54 = vmul.f32 %v517_v52, %v307_v53  ;;  %v519_v6 = vpop.eup %518 }
 0x5d3   :  { %295 = vadd.xlane.f32.xlu0 %v294_v49 }
 0x5d7   :  { %231 = vadd.xlane.f32.xlu0 %v228_v28 }
 0x652   :  { %v319_v55 = vpop.xlane.xlu1 %318 }
 0x653   :  { %v320_v56 = vadd.f32 %v319_v55, %v308_v54 }
 0x655   :  { %321 = vst.msk [vmem:[#allocation4] sm:$0xff] %vm65_vm9, %v320_v56 }
 0x656   :  { %v230_v62 = vpop.xlane.xlu1 %229 }
 0x657   :  { %v234_v0 = vsel %vm65_vm9, %v230_v62, 0.0 }
 0x65c   :  { %v390_v7 = vpop.xlane.xlu0 %389  ;;  %v327_v57 = vld [vmem:[#allocation4] sm:$0xff] }
 0x65d   :  { %v379_v58 = vmul.f32 %v519_v6, %v327_v57 }
 0x65f   :  { %v391_v60 = vadd.f32 %v390_v7, %v379_v58 }
 0x660   :  { %v296_v48 = vpop.xlane.xlu0 %295 }
 0x661   :  { %520 = vlog2.f32 %v391_v60  ;;  %v297_v61 = vadd.f32 %v296_v48, %v291_v59 }
 0x663   :  { %298 = vst.msk [vmem:[#allocation5] sm:$0xff] %vm65_vm9, %v297_v61 }
 0x664   :  { %v232_v63 = vpop.xlane.xlu0 %231 }
 0x665   :  { %v235_v1 = vsel %vm65_vm9, %v232_v63, 0.0 }
 0x666   :  { %v236_v3 = vadd.f32 %v235_v1, %v234_v0 }
 0x668   :  { %237 = vadd.xlane.f32.xlu1 %v236_v3 }
 0x66a   :  { %v395_v9 = vld [vmem:[#allocation5] sm:$0xff] }
 0x66b   :  { %v521_v4 = vpop.eup %520 }
 0x66c   :  { %v393_v5 = vmul.f32 0.6931472, %v521_v4 }
 0x66e   :  { %v394_v8 = vadd.f32 %v393_v5, %v375_v35 }
 0x670   :  { %v396_v10 = vsub.f32 %v394_v8, %v395_v9 }
 0x672   :  { %v397_v11 = vsel %vm65_vm9, %v396_v10, 0.0 }
 0x673   :  { %398 = vadd.xlane.f32.xlu0 %v397_v11 }
 0x674   :  { %577 = shalt.err (!%p574_p6)
}
 0x675   :  { %s578_s11 = scalar_lea.hbm %s810_s6, 256 }
 0x676   :  { %p579_p7 = scmp.ne.s32.totalorder %s810_s6, %s578_s11  ;;  %p582_p8 = scmp.lt.u32.totalorder %s578_s11, %s810_s6 }
 0x678   :  { %p584_p9 = pnand %p582_p8, %p579_p7 }
 0x67a   :  { %587 = shalt.err (!%p584_p9)
}
 0x67b   :  { %s625_s16 = smov 128   ;;  %s626_s17 = smov 8  }
 0x67c   :  { %429 = dma.vmem_to_hbm [thread:$0]  %s424_s30, 256, %s810_s6, [#allocation8], %s625_s16, %s625_s16, %s626_s17  }
 0x67d   :  { %s588_s23 = scalar_lea.hbm %s811_s7, 16 }
 0x67e   :  { %p589_p10 = scmp.ne.s32.totalorder %s811_s7, %s588_s23  ;;  %p592_p11 = scmp.lt.u32.totalorder %s588_s23, %s811_s7 }
 0x680   :  { %p594_p12 = pnand %p592_p11, %p589_p10 }
 0x6f5   :  { %v238_v12 = vpop.xlane.xlu1 %237 }
 0x6f6   :  { %v239_v13 = vrot.slane %v238_v12, 4 }
 0x6f8   :  { %v240_v14 = vadd.f32 %v239_v13, %v238_v12 }
 0x6fa   :  { %v241_v15 = vrot.slane %v240_v14, 2 }
 0x6fc   :  { %v242_v17 = vadd.f32 %v241_v15, %v240_v14 }
 0x6fe   :  { %v243_v18 = vrot.slane %v242_v17, 1 }
 0x700   :  { %v399_v19 = vpop.xlane.xlu0 %398  ;;  %v244_v20 = vadd.f32 %v243_v18, %v242_v17 }
 0x701   :  { %v400_v21 = vrot.slane %v399_v19, 4 }
 0x702   :  { %484 = vpush %v244_v20 }
 0x703   :  { %v401_v22 = vadd.f32 %v400_v21, %v399_v19 }
 0x705   :  { %v402_v23 = vrot.slane %v401_v22, 2 }
 0x707   :  { %v403_v24 = vadd.f32 %v402_v23, %v401_v22 }
 0x709   :  { %v404_v25 = vrot.slane %v403_v24, 1 }
 0x70b   :  { %v405_v26 = vadd.f32 %v404_v25, %v403_v24 }
 0x70d   :  { %486 = vpush %v405_v26 }
 0x733   :  { %s485_s20 = spop %484 }
 0x734   :  { %s246_s21 = smul.f32 0.0625, %s485_s20 }
 0x736   :  { %249 = sst [smem:[#allocation14]] %s246_s21 }
 0x737   :  { %597 = shalt.err (!%p594_p12)
}
 0x738   :  { %s627_s1 = smov [#allocation14]   ;;  %s598_s30 = scalar_lea.hbm %s809_s5, 16 }
 0x739   :  { %437 = dma.smem_to_hbm %s627_s1, 16, %s811_s7, [#allocation15]  }
 0x73a   :  { %p599_p13 = scmp.ne.s32.totalorder %s809_s5, %s598_s30  ;;  %p602_p0 = scmp.lt.u32.totalorder %s598_s30, %s809_s5 }
 0x73c   :  { %p604_p1 = pnand %p602_p0, %p599_p13 }
 0x73e   :  { %s487_s27 = spop %486 }
 0x73f   :  { %s407_s28 = smul.f32 0.125, %s487_s27 }
 0x741   :  { %409 = sst [smem:[#allocation12]] %s407_s28 }
 0x742   :  { %607 = shalt.err (!%p604_p1)
}
 0x743   :  { %s628_s12 = smov [#allocation12]  }
 0x744   :  { %417 = dma.smem_to_hbm %s628_s12, 16, %s809_s5, [#allocation9]  }
 0x745   :  { %612 = dma.done.wait [#allocation9], 16  }
 0x746   :  { %613 = vsyncadd [#allocation9], 4294967280 }
 0x747   :  { %614 = dma.done.wait [#allocation8], 256  }
 0x748   :  { %615 = vsyncadd [#allocation8], 4294967040 }
 0x749   :  { %616 = dma.done.wait [#allocation15], 16  }
 0x74a   :  { %617 = vsyncadd [#allocation15], 4294967280 }
 0x74b   :  { %447 = sfence }
 0x74c   :  { %448 = vsyncpa [#allocation7], 1 }
 0x74d   :  { %449 = vsyncpa [#allocation11], 1 }
 0x74e   :  { %450 = vsyncpa [#allocation8], 1 }
 0x74f   :  { %451 = vsyncpa [#allocation9], 1 }
 0x750   :  { %452 = vsyncpa [#allocation15], 1 }

</bundles_post_ra>
